<compile_context>
chip_gen: v7x
topology: tpu7x:2x2x1
jax: 0.10.0
libtpu: 0.0.40
codegen_flags: <defaults>
</compile_context>

<pallas_src>
import functools

import jax
import jax.numpy as jnp
from jax.experimental import pallas as pl
from jax.experimental.pallas import tpu as pltpu

BN_EPS = 1e-5
LANE = 128
SUBLANE = 8


def _round_up(n, m):
    return ((n + m - 1) // m) * m


# ---------------------------------------------------------------------------
# Kernel: 5 fused (matmul + bias [+ ReLU]) stages, tanh-sigmoid epilogue.
# Weights are pre-transposed to [in, out] and pre-folded with the BN affine.
# ---------------------------------------------------------------------------
def mlp_kernel(x_ref,
               w1_ref, b1_ref, w2_ref, b2_ref, w3_ref, b3_ref,
               w4_ref, b4_ref, w5_ref, b5_ref,
               o_ref):
    def dense(h, w_ref, b_ref):
        # h: bf16 [TB, in], w: bf16 [in, out_pad], b: f32 [1, out_pad]
        return jnp.dot(h, w_ref[...], preferred_element_type=jnp.float32) + b_ref[...]

    h = x_ref[...].astype(jnp.bfloat16)                             # cast in-kernel
    h = jnp.maximum(dense(h, w1_ref, b1_ref), 0.0)                  # f32
    h = jnp.maximum(dense(h.astype(jnp.bfloat16), w2_ref, b2_ref), 0.0)
    h = jnp.maximum(dense(h.astype(jnp.bfloat16), w3_ref, b3_ref), 0.0)
    h = jnp.maximum(dense(h.astype(jnp.bfloat16), w4_ref, b4_ref), 0.0)
    logits = dense(h.astype(jnp.bfloat16), w5_ref, b5_ref)          # (TB, 128-pad)

    # Narrow to the real output columns in registers, then a single-EUP-push
    # exact sigmoid: sigmoid(z) = 0.5 * (1 + tanh(z/2)).
    n_out = o_ref.shape[-1]
    z = logits[:, :n_out]
    o_ref[...] = 0.5 * (1.0 + jnp.tanh(0.5 * z))


# ---------------------------------------------------------------------------
# Wrapper: batch-tiled grid (>=2 steps when possible), resident bf16 weights,
# unpadded feature dim, narrow full-last-dim f32 output.
# ---------------------------------------------------------------------------
@functools.partial(jax.jit, static_argnames=("n_output",))
def mlp_forward(x, weights, biases, n_output):
    B, F = x.shape

    # Batch tile: aim for >=2 grid steps (v7x megacore), multiple of 8, cap 1024.
    Bp8 = _round_up(B, SUBLANE)
    if Bp8 >= 2 * SUBLANE:
        tb = min(1024, _round_up(pl.cdiv(Bp8, 2), SUBLANE))
    else:
        tb = Bp8
    n_steps = pl.cdiv(B, tb)
    Bp = tb * n_steps
    if Bp != B:
        x = jnp.pad(x, ((0, Bp - B), (0, 0)))   # pad batch rows only when needed

    params = []
    in_specs = [pl.BlockSpec((tb, F), lambda i: (i, 0))]            # x tile (f32)
    for w, b in zip(weights, biases):
        params += [w, b]
        in_specs += [pl.BlockSpec(w.shape, lambda i: (0, 0)),       # resident
                     pl.BlockSpec(b.shape, lambda i: (0, 0))]       # resident

    # Explicit VMEM budget: resident weights/biases + double-buffered x/out tiles.
    weight_bytes = sum(int(p.size) * p.dtype.itemsize for p in params)
    io_bytes = 2 * (tb * F * x.dtype.itemsize + tb * n_output * 4)
    vmem_limit = int(min(48 * 1024 * 1024,
                         max(16 * 1024 * 1024,
                             2 * weight_bytes + io_bytes + (2 << 20))))

    out = pl.pallas_call(
        mlp_kernel,
        out_shape=jax.ShapeDtypeStruct((Bp, n_output), jnp.float32),
        grid=(n_steps,),
        in_specs=in_specs,
        out_specs=pl.BlockSpec((tb, n_output), lambda i: (i, 0)),
        compiler_params=pltpu.CompilerParams(
            dimension_semantics=("parallel",),      # megacore sharding on v7x
            vmem_limit_bytes=vmem_limit),
    )(x, *params)

    return out[:B]


# ---------------------------------------------------------------------------
# Parameter construction: raw PyTorch-style params, BN folding, padding.
# ---------------------------------------------------------------------------
def make_raw_params(key, n_feature, n_hidden, n_output):
    """Returns a list of (W [in,out], b [out], bn) where bn is
    (gamma, beta, running_mean, running_var) or None for the output layer."""
    dims = [(n_feature, n_hidden),
            (n_hidden, n_hidden // 2),
            (n_hidden // 2, n_hidden // 4),
            (n_hidden // 4, n_hidden // 8),
            (n_hidden // 8, n_output)]
    keys = iter(jax.random.split(key, 6 * len(dims)))
    layers = []
    for i, (din, dout) in enumerate(dims):
        bound = 1.0 / (din ** 0.5)
        W = jax.random.uniform(next(keys), (din, dout), jnp.float32, -bound, bound)
        b = jax.random.uniform(next(keys), (dout,), jnp.float32, -bound, bound)
        bn = None
        if i < len(dims) - 1:
            # Non-trivial running stats so the BN fold is actually exercised.
            g = 1.0 + 0.1 * jax.random.normal(next(keys), (dout,), jnp.float32)
            be = 0.1 * jax.random.normal(next(keys), (dout,), jnp.float32)
            m = 0.1 * jax.random.normal(next(keys), (dout,), jnp.float32)
            v = 1.0 + 0.1 * jax.random.uniform(next(keys), (dout,), jnp.float32)
            bn = (g, be, m, v)
        layers.append((W, b, bn))
    return layers


def fold_and_pad(layers):
    """Fold each eval-mode BN (which follows the ReLU of layer i) into the
    weights/bias of layer i+1, then zero-pad the inter-layer dims to 128.
    The first layer's input dim (feature dim) is left unpadded so the x read
    is not inflated.  Returns (bf16 weights [in(,pad), out_pad],
    f32 biases [1, out_pad])."""
    weights, biases = [], []
    carry_scale = None
    carry_shift = None
    for idx, (W, b, bn) in enumerate(layers):
        if carry_scale is not None:
            b = carry_shift @ W + b                    # shift @ W + b
            W = carry_scale[:, None] * W               # diag(scale) @ W
        if bn is not None:
            g, be, m, v = bn
            s = g * jax.lax.rsqrt(v + BN_EPS)
            carry_scale, carry_shift = s, be - m * s
        else:
            carry_scale = carry_shift = None
        din, dout = W.shape
        dinp = din if idx == 0 else _round_up(din, LANE)   # feature dim unpadded
        doutp = _round_up(dout, LANE)
        Wp = jnp.zeros((dinp, doutp), jnp.float32).at[:din, :dout].set(W)
        bp = jnp.zeros((1, doutp), jnp.float32).at[0, :dout].set(b)
        weights.append(Wp.astype(jnp.bfloat16))
        biases.append(bp)
    return weights, biases


# ---------------------------------------------------------------------------
# Pure-JAX f32 reference with the exact PyTorch eval-mode semantics.
# ---------------------------------------------------------------------------
def reference_forward(x, layers):
    h = x
    for (W, b, bn) in layers:
        h = h @ W + b
        if bn is not None:
            h = jnp.maximum(h, 0.0)                    # ReLU
            g, be, m, v = bn                           # BatchNorm1d (eval)
            h = (h - m) * jax.lax.rsqrt(v + BN_EPS) * g + be
            # Dropout == identity in eval mode.
    return jax.nn.sigmoid(h)


if __name__ == "__main__":
    key = jax.random.PRNGKey(0)
    k_x, k_p = jax.random.split(key)

    n_feature, n_hidden, n_output = 32, 32, 2
    layers = make_raw_params(k_p, n_feature, n_hidden, n_output)
    weights, biases = fold_and_pad(layers)

    # Case 1: small batch, single grid step, no batch padding.
    batch = 8
    x = jax.random.normal(k_x, (batch, n_feature), jnp.float32)
    out = jax.block_until_ready(mlp_forward(x, weights, biases, n_output))
    ref = reference_forward(x, layers)
    assert out.shape == (batch, n_output)
    # Loose tolerance accounts for bf16 weights/activations over 5 layers.
    assert jnp.allclose(out, ref, atol=2e-2, rtol=2e-2), "mismatch vs reference (B=8)"

    # Case 2: exercises the 2-step grid + padded-batch path.
    batch2 = 24
    x2 = jax.random.normal(jax.random.fold_in(k_x, 1), (batch2, n_feature), jnp.float32)
    out2 = jax.block_until_ready(mlp_forward(x2, weights, biases, n_output))
    ref2 = reference_forward(x2, layers)
    assert out2.shape == (batch2, n_output)
    assert jnp.allclose(out2, ref2, atol=2e-2, rtol=2e-2), "mismatch vs reference (B=24)"

    print("KERNEL_OK")
</pallas_src>

<mosaic_0001>
module attributes {stable_mosaic.version = 11 : i64} {
  func.func @mlp_kernel(%arg0: i32, %arg1: memref<8x32xf32, #tpu.memory_space<vmem>>, %arg2: memref<32x128xbf16, #tpu.memory_space<vmem>>, %arg3: memref<1x128xf32, #tpu.memory_space<vmem>>, %arg4: memref<128x128xbf16, #tpu.memory_space<vmem>>, %arg5: memref<1x128xf32, #tpu.memory_space<vmem>>, %arg6: memref<128x128xbf16, #tpu.memory_space<vmem>>, %arg7: memref<1x128xf32, #tpu.memory_space<vmem>>, %arg8: memref<128x128xbf16, #tpu.memory_space<vmem>>, %arg9: memref<1x128xf32, #tpu.memory_space<vmem>>, %arg10: memref<128x128xbf16, #tpu.memory_space<vmem>>, %arg11: memref<1x128xf32, #tpu.memory_space<vmem>>, %arg12: memref<8x2xf32, #tpu.memory_space<vmem>>) attributes {dimension_semantics = [#tpu.dimension_semantics<parallel>], iteration_bounds = array<i64: 1>, scalar_prefetch = 0 : i64, scratch_operands = 0 : i64, tpu.core_type = #tpu.core_type<tc>, window_params = [{transform_indices = @transform_0, window_bounds = array<i64: 8, 32>}, {pipeline_mode = #tpu.pipeline_mode<synchronous>, transform_indices = @transform_1, window_bounds = array<i64: 32, 128>}, {pipeline_mode = #tpu.pipeline_mode<synchronous>, transform_indices = @transform_2, window_bounds = array<i64: 1, 128>}, {pipeline_mode = #tpu.pipeline_mode<synchronous>, transform_indices = @transform_3, window_bounds = array<i64: 128, 128>}, {pipeline_mode = #tpu.pipeline_mode<synchronous>, transform_indices = @transform_4, window_bounds = array<i64: 1, 128>}, {pipeline_mode = #tpu.pipeline_mode<synchronous>, transform_indices = @transform_5, window_bounds = array<i64: 128, 128>}, {pipeline_mode = #tpu.pipeline_mode<synchronous>, transform_indices = @transform_6, window_bounds = array<i64: 1, 128>}, {pipeline_mode = #tpu.pipeline_mode<synchronous>, transform_indices = @transform_7, window_bounds = array<i64: 128, 128>}, {pipeline_mode = #tpu.pipeline_mode<synchronous>, transform_indices = @transform_8, window_bounds = array<i64: 1, 128>}, {pipeline_mode = #tpu.pipeline_mode<synchronous>, transform_indices = @transform_9, window_bounds = array<i64: 128, 128>}, {pipeline_mode = #tpu.pipeline_mode<synchronous>, transform_indices = @transform_10, window_bounds = array<i64: 1, 128>}, {transform_indices = @transform_11, window_bounds = array<i64: 8, 2>}]} {
    %c0 = arith.constant 0 : index
    %c0_0 = arith.constant 0 : index
    %0 = vector.load %arg1[%c0, %c0_0] : memref<8x32xf32, #tpu.memory_space<vmem>>, vector<8x32xf32>
    %1 = arith.truncf %0 : vector<8x32xf32> to vector<8x32xbf16>
    %c0_1 = arith.constant 0 : index
    %c0_2 = arith.constant 0 : index
    %2 = vector.load %arg2[%c0_1, %c0_2] : memref<32x128xbf16, #tpu.memory_space<vmem>>, vector<32x128xbf16>
    %cst = arith.constant dense<0.000000e+00> : vector<8x128xf32>
    %3 = tpu.matmul %1, %2, %cst {dimension_numbers = #tpu.dot_dimension_numbers<[1], [0], [0], [1], [0, 0, 1, 1], [], []>} : vector<8x32xbf16>, vector<32x128xbf16>, vector<8x128xf32> -> vector<8x128xf32>
    %c0_3 = arith.constant 0 : index
    %c0_4 = arith.constant 0 : index
    %4 = vector.load %arg3[%c0_3, %c0_4] : memref<1x128xf32, #tpu.memory_space<vmem>>, vector<1x128xf32>
    %5 = vector.broadcast %4 : vector<1x128xf32> to vector<8x128xf32>
    %6 = arith.addf %3, %5 : vector<8x128xf32>
    %cst_5 = arith.constant 0.000000e+00 : f32
    %7 = vector.broadcast %cst_5 : f32 to vector<8x128xf32>
    %8 = arith.maximumf %6, %7 : vector<8x128xf32>
    %9 = arith.truncf %8 : vector<8x128xf32> to vector<8x128xbf16>
    %c0_6 = arith.constant 0 : index
    %c0_7 = arith.constant 0 : index
    %10 = vector.load %arg4[%c0_6, %c0_7] : memref<128x128xbf16, #tpu.memory_space<vmem>>, vector<128x128xbf16>
    %cst_8 = arith.constant dense<0.000000e+00> : vector<8x128xf32>
    %11 = tpu.matmul %9, %10, %cst_8 {dimension_numbers = #tpu.dot_dimension_numbers<[1], [0], [0], [1], [0, 0, 1, 1], [], []>} : vector<8x128xbf16>, vector<128x128xbf16>, vector<8x128xf32> -> vector<8x128xf32>
    %c0_9 = arith.constant 0 : index
    %c0_10 = arith.constant 0 : index
    %12 = vector.load %arg5[%c0_9, %c0_10] : memref<1x128xf32, #tpu.memory_space<vmem>>, vector<1x128xf32>
    %13 = vector.broadcast %12 : vector<1x128xf32> to vector<8x128xf32>
    %14 = arith.addf %11, %13 : vector<8x128xf32>
    %cst_11 = arith.constant 0.000000e+00 : f32
    %15 = vector.broadcast %cst_11 : f32 to vector<8x128xf32>
    %16 = arith.maximumf %14, %15 : vector<8x128xf32>
    %17 = arith.truncf %16 : vector<8x128xf32> to vector<8x128xbf16>
    %c0_12 = arith.constant 0 : index
    %c0_13 = arith.constant 0 : index
    %18 = vector.load %arg6[%c0_12, %c0_13] : memref<128x128xbf16, #tpu.memory_space<vmem>>, vector<128x128xbf16>
    %cst_14 = arith.constant dense<0.000000e+00> : vector<8x128xf32>
    %19 = tpu.matmul %17, %18, %cst_14 {dimension_numbers = #tpu.dot_dimension_numbers<[1], [0], [0], [1], [0, 0, 1, 1], [], []>} : vector<8x128xbf16>, vector<128x128xbf16>, vector<8x128xf32> -> vector<8x128xf32>
    %c0_15 = arith.constant 0 : index
    %c0_16 = arith.constant 0 : index
    %20 = vector.load %arg7[%c0_15, %c0_16] : memref<1x128xf32, #tpu.memory_space<vmem>>, vector<1x128xf32>
    %21 = vector.broadcast %20 : vector<1x128xf32> to vector<8x128xf32>
    %22 = arith.addf %19, %21 : vector<8x128xf32>
    %cst_17 = arith.constant 0.000000e+00 : f32
    %23 = vector.broadcast %cst_17 : f32 to vector<8x128xf32>
    %24 = arith.maximumf %22, %23 : vector<8x128xf32>
    %25 = arith.truncf %24 : vector<8x128xf32> to vector<8x128xbf16>
    %c0_18 = arith.constant 0 : index
    %c0_19 = arith.constant 0 : index
    %26 = vector.load %arg8[%c0_18, %c0_19] : memref<128x128xbf16, #tpu.memory_space<vmem>>, vector<128x128xbf16>
    %cst_20 = arith.constant dense<0.000000e+00> : vector<8x128xf32>
    %27 = tpu.matmul %25, %26, %cst_20 {dimension_numbers = #tpu.dot_dimension_numbers<[1], [0], [0], [1], [0, 0, 1, 1], [], []>} : vector<8x128xbf16>, vector<128x128xbf16>, vector<8x128xf32> -> vector<8x128xf32>
    %c0_21 = arith.constant 0 : index
    %c0_22 = arith.constant 0 : index
    %28 = vector.load %arg9[%c0_21, %c0_22] : memref<1x128xf32, #tpu.memory_space<vmem>>, vector<1x128xf32>
    %29 = vector.broadcast %28 : vector<1x128xf32> to vector<8x128xf32>
    %30 = arith.addf %27, %29 : vector<8x128xf32>
    %cst_23 = arith.constant 0.000000e+00 : f32
    %31 = vector.broadcast %cst_23 : f32 to vector<8x128xf32>
    %32 = arith.maximumf %30, %31 : vector<8x128xf32>
    %33 = arith.truncf %32 : vector<8x128xf32> to vector<8x128xbf16>
    %c0_24 = arith.constant 0 : index
    %c0_25 = arith.constant 0 : index
    %34 = vector.load %arg10[%c0_24, %c0_25] : memref<128x128xbf16, #tpu.memory_space<vmem>>, vector<128x128xbf16>
    %cst_26 = arith.constant dense<0.000000e+00> : vector<8x128xf32>
    %35 = tpu.matmul %33, %34, %cst_26 {dimension_numbers = #tpu.dot_dimension_numbers<[1], [0], [0], [1], [0, 0, 1, 1], [], []>} : vector<8x128xbf16>, vector<128x128xbf16>, vector<8x128xf32> -> vector<8x128xf32>
    %c0_27 = arith.constant 0 : index
    %c0_28 = arith.constant 0 : index
    %36 = vector.load %arg11[%c0_27, %c0_28] : memref<1x128xf32, #tpu.memory_space<vmem>>, vector<1x128xf32>
    %37 = vector.broadcast %36 : vector<1x128xf32> to vector<8x128xf32>
    %38 = arith.addf %35, %37 : vector<8x128xf32>
    %39 = vector.extract_strided_slice %38 {offsets = [0, 0], sizes = [8, 2], strides = [1, 1]} : vector<8x128xf32> to vector<8x2xf32>
    %cst_29 = arith.constant 5.000000e-01 : f32
    %40 = vector.broadcast %cst_29 : f32 to vector<8x2xf32>
    %41 = arith.mulf %40, %39 : vector<8x2xf32>
    %42 = math.tanh %41 : vector<8x2xf32>
    %cst_30 = arith.constant 1.000000e+00 : f32
    %43 = vector.broadcast %cst_30 : f32 to vector<8x2xf32>
    %44 = arith.addf %43, %42 : vector<8x2xf32>
    %cst_31 = arith.constant 5.000000e-01 : f32
    %45 = vector.broadcast %cst_31 : f32 to vector<8x2xf32>
    %46 = arith.mulf %45, %44 : vector<8x2xf32>
    %c0_32 = arith.constant 0 : index
    %c0_33 = arith.constant 0 : index
    %47 = vector.load %arg12[%c0_32, %c0_33] : memref<8x2xf32, #tpu.memory_space<vmem>>, vector<8x2xf32>
    tpu.vector_store %arg12[%c0_32, %c0_33], %46 {strides = array<i32>} : memref<8x2xf32, #tpu.memory_space<vmem>>, vector<8x2xf32>,
    return
  }
  func.func @transform_0(%arg0: i32) -> (i32, i32) {
    %c0_i32 = arith.constant 0 : i32
    %c0_i32_0 = arith.constant 0 : i32
    return %arg0, %c0_i32 : i32, i32
  }
  func.func @transform_1(%arg0: i32) -> (i32, i32) {
    %c0_i32 = arith.constant 0 : i32
    %c0_i32_0 = arith.constant 0 : i32
    %c0_i32_1 = arith.constant 0 : i32
    return %c0_i32, %c0_i32_0 : i32, i32
  }
  func.func @transform_2(%arg0: i32) -> (i32, i32) {
    %c0_i32 = arith.constant 0 : i32
    %c0_i32_0 = arith.constant 0 : i32
    %c0_i32_1 = arith.constant 0 : i32
    return %c0_i32, %c0_i32_0 : i32, i32
  }
  func.func @transform_3(%arg0: i32) -> (i32, i32) {
    %c0_i32 = arith.constant 0 : i32
    %c0_i32_0 = arith.constant 0 : i32
    %c0_i32_1 = arith.constant 0 : i32
    return %c0_i32, %c0_i32_0 : i32, i32
  }
  func.func @transform_4(%arg0: i32) -> (i32, i32) {
    %c0_i32 = arith.constant 0 : i32
    %c0_i32_0 = arith.constant 0 : i32
    %c0_i32_1 = arith.constant 0 : i32
    return %c0_i32, %c0_i32_0 : i32, i32
  }
  func.func @transform_5(%arg0: i32) -> (i32, i32) {
    %c0_i32 = arith.constant 0 : i32
    %c0_i32_0 = arith.constant 0 : i32
    %c0_i32_1 = arith.constant 0 : i32
    return %c0_i32, %c0_i32_0 : i32, i32
  }
  func.func @transform_6(%arg0: i32) -> (i32, i32) {
    %c0_i32 = arith.constant 0 : i32
    %c0_i32_0 = arith.constant 0 : i32
    %c0_i32_1 = arith.constant 0 : i32
    return %c0_i32, %c0_i32_0 : i32, i32
  }
  func.func @transform_7(%arg0: i32) -> (i32, i32) {
    %c0_i32 = arith.constant 0 : i32
    %c0_i32_0 = arith.constant 0 : i32
    %c0_i32_1 = arith.constant 0 : i32
    return %c0_i32, %c0_i32_0 : i32, i32
  }
  func.func @transform_8(%arg0: i32) -> (i32, i32) {
    %c0_i32 = arith.constant 0 : i32
    %c0_i32_0 = arith.constant 0 : i32
    %c0_i32_1 = arith.constant 0 : i32
    return %c0_i32, %c0_i32_0 : i32, i32
  }
  func.func @transform_9(%arg0: i32) -> (i32, i32) {
    %c0_i32 = arith.constant 0 : i32
    %c0_i32_0 = arith.constant 0 : i32
    %c0_i32_1 = arith.constant 0 : i32
    return %c0_i32, %c0_i32_0 : i32, i32
  }
  func.func @transform_10(%arg0: i32) -> (i32, i32) {
    %c0_i32 = arith.constant 0 : i32
    %c0_i32_0 = arith.constant 0 : i32
    %c0_i32_1 = arith.constant 0 : i32
    return %c0_i32, %c0_i32_0 : i32, i32
  }
  func.func @transform_11(%arg0: i32) -> (i32, i32) {
    %c0_i32 = arith.constant 0 : i32
    %c0_i32_0 = arith.constant 0 : i32
    return %arg0, %c0_i32 : i32, i32
  }
}

</mosaic_0001>

<bundles_post_ra>
// kernel: mlp_forward.1
= control target key start
LH: loop header
LB: loop body
LE: loop exit
PB: predicated region body
PF: predicated region fallthrough
CT: control target
= control target key end

     0   :  { %16 = vsyncpa [#allocation3], 0  ;;  %s1226_s0 = inlined_call_operand.hbm [shape: f32[8,32], index: 0, kind: input, shape index: {}]   ;;  %s1227_s1 = inlined_call_operand.hbm [shape: bf16[32,128], index: 1, kind: input, shape index: {}]   ;;  %s1228_s2 = inlined_call_operand.vmem [shape: f32[1,128], index: 2, kind: input, shape index: {}]   ;;  %s1229_s3 = inlined_call_operand.hbm [shape: bf16[128,128], index: 3, kind: input, shape index: {}]   ;;  %s1230_s4 = inlined_call_operand.vmem [shape: f32[1,128], index: 4, kind: input, shape index: {}]   ;;  %s1231_s5 = inlined_call_operand.hbm [shape: bf16[128,128], index: 5, kind: input, shape index: {}]   ;;  %s1232_s6 = inlined_call_operand.vmem [shape: f32[1,128], index: 6, kind: input, shape index: {}]   ;;  %s1233_s7 = inlined_call_operand.hbm [shape: bf16[128,128], index: 7, kind: input, shape index: {}]   ;;  %s1234_s8 = inlined_call_operand.vmem [shape: f32[1,128], index: 8, kind: input, shape index: {}]   ;;  %s1235_s9 = inlined_call_operand.hbm [shape: bf16[128,128], index: 9, kind: input, shape index: {}]   ;;  %s1236_s10 = inlined_call_operand.vmem [shape: f32[1,128], index: 10, kind: input, shape index: {}]   ;;  %s1237_s11 = inlined_call_operand.vmem [shape: f32[8,2], index: 11, kind: output, shape index: {}]  }
   0x1   :  { %17 = vsyncpa [#allocation5], 0 }
   0x2   :  { %18 = vsyncpa [#allocation8], 0 }
   0x3   :  { %19 = vsyncpa [#allocation11], 0  ;;  %s1007_s17 = smov [#allocation4]   ;;  %s867_s21 = scalar_lea.hbm %s1227_s1, 256 }
   0x4   :  { %s35_s18 = sshll.u32 %s1007_s17, 4  ;;  %p868_p0 = scmp.ne.s32.totalorder %s1227_s1, %s867_s21  ;;  %s36_s18 = int_to_ptr.vmem [resolvable:$true] %s35_s18 }
   0x5   :  { %p871_p1 = scmp.lt.u32.totalorder %s867_s21, %s1227_s1 }
   0x7   :  { %p873_p2 = pnand %p871_p1, %p868_p0 }
   0x9   :  { %876 = shalt.err (!%p873_p2)
}
   0xa   :  { %s877_s26 = scalar_lea.vmem %s36_s18, 256  ;;  %p882_p4 = scmp.lt.s32.totalorder %s36_s18, %s36_s18 }
   0xb   :  { %p878_p3 = scmp.ne.s32.totalorder %s36_s18, %s877_s26  ;;  %p883_p5 = scmp.lt.s32.totalorder %s877_s26, %s877_s26 }
   0xd   :  { %p884_p6 = por %p883_p5, %p882_p4 }
   0xf   :  { %p885_p7 = pnand %p884_p6, %p878_p3 }
  0x11   :  { %888 = shalt.err (!%p885_p7)
}
  0x12   :  { %s1008_s27 = smov 64   ;;  %s1009_s28 = smov 4  }
  0x13   :  { %41 = dma.hbm_to_vmem [thread:$0]  %s1227_s1, 256, %s36_s18, [#allocation5], %s1008_s27, %s1008_s27, %s1009_s28  }
  0x14   :  { %s1010_s12 = smov [#allocation7]   ;;  %s1011_s14 = smov [#allocation2]  }
  0x15   :  { %s63_s13 = sshll.u32 %s1010_s12, 4  ;;  %s26_s15 = sshll.u32 %s1011_s14, 4  ;;  %s64_s13 = int_to_ptr.vmem [resolvable:$true] %s63_s13  ;;  %s27_s15 = int_to_ptr.vmem [resolvable:$true] %s26_s15 }
  0x16   :  { %s889_s19 = scalar_lea.hbm %s1231_s5, 1024 }
  0x17   :  { %p890_p8 = scmp.ne.s32.totalorder %s1231_s5, %s889_s19  ;;  %p893_p9 = scmp.lt.u32.totalorder %s889_s19, %s1231_s5 }
  0x19   :  { %p895_p10 = pnand %p893_p9, %p890_p8 }
  0x1b   :  { %898 = shalt.err (!%p895_p10)
}
  0x1c   :  { %s899_s1 = scalar_lea.vmem %s64_s13, 1024  ;;  %p904_p12 = scmp.lt.s32.totalorder %s64_s13, %s64_s13 }
  0x1d   :  { %p900_p11 = scmp.ne.s32.totalorder %s64_s13, %s899_s1  ;;  %p905_p13 = scmp.lt.s32.totalorder %s899_s1, %s899_s1 }
  0x1f   :  { %p906_p0 = por %p905_p13, %p904_p12 }
  0x21   :  { %p907_p1 = pnand %p906_p0, %p900_p11 }
  0x23   :  { %910 = shalt.err (!%p907_p1)
}
  0x24   :  { %69 = dma.hbm_to_vmem [thread:$0]  %s1231_s5, 1024, %s64_s13, [#allocation8], %s1008_s27, %s1008_s27, %s1009_s28  }
  0x25   :  { %s911_s29 = scalar_lea.hbm %s1226_s0, 128 }
  0x26   :  { %p912_p2 = scmp.ne.s32.totalorder %s1226_s0, %s911_s29  ;;  %p915_p3 = scmp.lt.u32.totalorder %s911_s29, %s1226_s0 }
  0x28   :  { %p917_p4 = pnand %p915_p3, %p912_p2 }
  0x2a   :  { %920 = shalt.err (!%p917_p4)
}
  0x2b   :  { %s921_s17 = scalar_lea.vmem %s27_s15, 128  ;;  %p926_p6 = scmp.lt.s32.totalorder %s27_s15, %s27_s15 }
  0x2c   :  { %p922_p5 = scmp.ne.s32.totalorder %s27_s15, %s921_s17  ;;  %p927_p7 = scmp.lt.s32.totalorder %s921_s17, %s921_s17 }
  0x2e   :  { %p928_p8 = por %p927_p7, %p926_p6 }
  0x30   :  { %p929_p9 = pnand %p928_p8, %p922_p5 }
  0x32   :  { %932 = shalt.err (!%p929_p9)
}
  0x33   :  { %29 = dma.hbm_to_vmem [thread:$0]  %s1226_s0, 128, %s27_s15, [#allocation3]  }
  0x34   :  { %s1012_s19 = smov [#allocation6]   ;;  %s1013_s21 = smov [#allocation9]  }
  0x35   :  { %s49_s20 = sshll.u32 %s1012_s19, 4  ;;  %s77_s22 = sshll.u32 %s1013_s21, 4  ;;  %s50_s20 = int_to_ptr.vmem [resolvable:$true] %s49_s20  ;;  %s78_s22 = int_to_ptr.vmem [resolvable:$true] %s77_s22 }
  0x36   :  { %s933_s18 = scalar_lea.hbm %s1229_s3, 1024 }
  0x37   :  { %p934_p10 = scmp.ne.s32.totalorder %s1229_s3, %s933_s18  ;;  %p937_p11 = scmp.lt.u32.totalorder %s933_s18, %s1229_s3 }
  0x39   :  { %p939_p12 = pnand %p937_p11, %p934_p10 }
  0x3b   :  { %942 = shalt.err (!%p939_p12)
}
  0x3c   :  { %s943_s0 = scalar_lea.vmem %s50_s20, 1024  ;;  %p948_p0 = scmp.lt.s32.totalorder %s50_s20, %s50_s20 }
  0x3d   :  { %p944_p13 = scmp.ne.s32.totalorder %s50_s20, %s943_s0  ;;  %p949_p1 = scmp.lt.s32.totalorder %s943_s0, %s943_s0 }
  0x3f   :  { %p950_p2 = por %p949_p1, %p948_p0 }
  0x41   :  { %p951_p3 = pnand %p950_p2, %p944_p13 }
  0x43   :  { %954 = shalt.err (!%p951_p3)
}
  0x44   :  { %55 = dma.hbm_to_vmem [thread:$0]  %s1229_s3, 1024, %s50_s20, [#allocation5], %s1008_s27, %s1008_s27, %s1009_s28  }
  0x45   :  { %s955_s16 = scalar_lea.hbm %s1233_s7, 1024 }
  0x46   :  { %p956_p4 = scmp.ne.s32.totalorder %s1233_s7, %s955_s16  ;;  %p959_p5 = scmp.lt.u32.totalorder %s955_s16, %s1233_s7 }
  0x48   :  { %p961_p6 = pnand %p959_p5, %p956_p4 }
  0x4a   :  { %964 = shalt.err (!%p961_p6)
}
  0x4b   :  { %s965_s21 = scalar_lea.vmem %s78_s22, 1024  ;;  %p970_p8 = scmp.lt.s32.totalorder %s78_s22, %s78_s22 }
  0x4c   :  { %p966_p7 = scmp.ne.s32.totalorder %s78_s22, %s965_s21  ;;  %p971_p9 = scmp.lt.s32.totalorder %s965_s21, %s965_s21 }
  0x4e   :  { %p972_p10 = por %p971_p9, %p970_p8 }
  0x50   :  { %p973_p11 = pnand %p972_p10, %p966_p7 }
  0x52   :  { %976 = shalt.err (!%p973_p11)
}
  0x53   :  { %83 = dma.hbm_to_vmem [thread:$0]  %s1233_s7, 1024, %s78_s22, [#allocation8], %s1008_s27, %s1008_s27, %s1009_s28  }
  0x54   :  { %s1014_s23 = smov [#allocation10]   ;;  %s977_s25 = scalar_lea.hbm %s1235_s9, 1024 }
  0x55   :  { %s91_s1 = sshll.u32 %s1014_s23, 4  ;;  %p978_p12 = scmp.ne.s32.totalorder %s1235_s9, %s977_s25  ;;  %s92_s1 = int_to_ptr.vmem [resolvable:$true] %s91_s1 }
  0x56   :  { %p981_p13 = scmp.lt.u32.totalorder %s977_s25, %s1235_s9 }
  0x58   :  { %p983_p0 = pnand %p981_p13, %p978_p12 }
  0x5a   :  { %986 = shalt.err (!%p983_p0)
}
  0x5b   :  { %s987_s30 = scalar_lea.vmem %s92_s1, 1024  ;;  %p992_p2 = scmp.lt.s32.totalorder %s92_s1, %s92_s1 }
  0x5c   :  { %p988_p1 = scmp.ne.s32.totalorder %s92_s1, %s987_s30  ;;  %p993_p3 = scmp.lt.s32.totalorder %s987_s30, %s987_s30 }
  0x5e   :  { %p994_p4 = por %p993_p3, %p992_p2 }
  0x60   :  { %p995_p5 = pnand %p994_p4, %p988_p1 }
  0x62   :  { %998 = shalt.err (!%p995_p5)
}
  0x63   :  { %97 = dma.hbm_to_vmem [thread:$0]  %s1235_s9, 1024, %s92_s1, [#allocation11], %s1008_s27, %s1008_s27, %s1009_s28  }
  0x64   :  { %999 = dma.done.wait [#allocation3], 128  }
  0x65   :  { %1000 = vsyncadd [#allocation3], 4294967168 }
  0x66   :  { %1001 = dma.done.wait [#allocation5], 1280  }
  0x67   :  { %1002 = vsyncadd [#allocation5], 4294966016 }
  0x68   :  { %1003 = dma.done.wait [#allocation8], 2048  }
  0x69   :  { %1004 = vsyncadd [#allocation8], 4294965248 }
  0x6a   :  { %1005 = dma.done.wait [#allocation11], 1024  }
  0x6b   :  { %1006 = vsyncadd [#allocation11], 4294966272  ;;  %v1015_v0 = vmov 0.0   ;;  %vm1016_vm0 = vmmov 0   ;;  %v831_v1 = vld [vmem:[#allocation4] sm:$0xff]   ;;  %v832_v2 = vld [vmem:[#allocation4 + $0x8] sm:$0xff]  }
  0x6c   :  { %733 = vmatprep.subr.bf16.mxu0 %v1015_v0  ;;  %737 = vmatprep.mubr.msk.bf16.mxu0 %vm1016_vm0, %v1015_v0  ;;  %v119_v3 = vld [vmem:[#allocation2] sm:$0xff]  ;;  %v833_v4 = vld [vmem:[#allocation6] sm:$0xff]   ;;  %vm144_vm1 = vcmask 261120   ;;  %v835_v7 = vld [vmem:[#allocation6 + $0x10] sm:$0xff]   ;;  %vm644_vm2 = vcmask 15360  }
  0x6d   :  { %741 = vmatprep.subr.bf16.mxu1 %v1015_v0  ;;  %757 = vmatprep.mubr.msk.bf16.mxu1 %vm1016_vm0, %v1015_v0  ;;  %v120_v5 = vpack.c.bf16 %v119_v3, %v119_v3  ;;  %v834_v6 = vld [vmem:[#allocation6 + $0x8] sm:$0xff]   ;;  %v836_v8 = vld [vmem:[#allocation6 + $0x18] sm:$0xff]   ;;  %v837_v9 = vld [vmem:[#allocation6 + $0x20] sm:$0xff]  }
  0x6e   :  { %734 = vmatpush3.bf16.msra.mxu0 %v831_v1  ;;  %742 = vmatpush3.bf16.msra.mxu1 %v833_v4  ;;  %v838_v10 = vld [vmem:[#allocation6 + $0x28] sm:$0xff]   ;;  %v839_v11 = vld [vmem:[#allocation6 + $0x30] sm:$0xff]   ;;  %v840_v12 = vld [vmem:[#allocation6 + $0x38] sm:$0xff]  }
  0x6f   :  { %735 = vmatprep.subr.bf16.mxu0 %v1015_v0  ;;  %743 = vmatprep.subr.bf16.mxu1 %v1015_v0  ;;  %v841_v13 = vld [vmem:[#allocation7] sm:$0xff]   ;;  %v842_v14 = vld [vmem:[#allocation7 + $0x8] sm:$0xff]   ;;  %v843_v15 = vld [vmem:[#allocation7 + $0x10] sm:$0xff]  }
  0x70   :  { %v844_v16 = vld [vmem:[#allocation7 + $0x18] sm:$0xff]   ;;  %v845_v17 = vld [vmem:[#allocation7 + $0x20] sm:$0xff]   ;;  %v846_v18 = vld [vmem:[#allocation7 + $0x28] sm:$0xff]  }
  0x71   :  { %v654_v19 = vld [vmem:[%s1228_s2] ss:$0 sm:$0xff]  ;;  %v847_v27 = vld [vmem:[#allocation7 + $0x30] sm:$0xff]   ;;  %v848_v28 = vld [vmem:[#allocation7 + $0x38] sm:$0xff]  }
  0x72   :  { %736 = vmatpush3.bf16.msra.mxu0 %v832_v2  ;;  %744 = vmatpush3.bf16.msra.mxu1 %v834_v6  ;;  %v849_v29 = vld [vmem:[#allocation9] sm:$0xff]   ;;  %v850_v30 = vld [vmem:[#allocation9 + $0x8] sm:$0xff]   ;;  %v851_v31 = vld [vmem:[#allocation9 + $0x10] sm:$0xff]  }
  0x73   :  { %761 = vmatprep.subr.bf16.mxu0 %v1015_v0  ;;  %745 = vmatprep.subr.bf16.mxu1 %v1015_v0  ;;  %v852_v32 = vld [vmem:[#allocation9 + $0x18] sm:$0xff]   ;;  %v853_v33 = vld [vmem:[#allocation9 + $0x20] sm:$0xff]   ;;  %v854_v34 = vld [vmem:[#allocation9 + $0x28] sm:$0xff]  }
  0x74   :  { %v658_v35 = vld [vmem:[%s1230_s4] ss:$0 sm:$0xff]  ;;  %v855_v43 = vld [vmem:[#allocation9 + $0x30] sm:$0xff]   ;;  %v856_v44 = vld [vmem:[#allocation9 + $0x38] sm:$0xff]  }
  0x75   :  { %738 = vmatmul.mubr.msk.bf16.vlgmr.msra.gmra.mrb[0].mxu0 %vm144_vm1, %v120_v5  ;;  %v857_v45 = vld [vmem:[#allocation10] sm:$0xff]   ;;  %v858_v46 = vld [vmem:[#allocation10 + $0x8] sm:$0xff]   ;;  %v859_v47 = vld [vmem:[#allocation10 + $0x10] sm:$0xff]  }
  0x76   :  { %777 = vmatprep.mubr.msk.bf16.mxu0 %vm1016_vm0, %v1015_v0  ;;  %746 = vmatpush3.bf16.msra.mxu1 %v835_v7  ;;  %v860_v48 = vld [vmem:[#allocation10 + $0x18] sm:$0xff]   ;;  %v861_v49 = vld [vmem:[#allocation10 + $0x20] sm:$0xff]   ;;  %v862_v50 = vld [vmem:[#allocation10 + $0x28] sm:$0xff]  }
  0x77   :  { %747 = vmatprep.subr.bf16.mxu1 %v1015_v0  ;;  %762 = vmatpush3.bf16.msra.mxu0 %v841_v13  ;;  %v667_v51 = vld [vmem:[%s1232_s6] ss:$0 sm:$0xff]  ;;  %v863_v59 = vld [vmem:[#allocation10 + $0x30] sm:$0xff]   ;;  %v864_v60 = vld [vmem:[#allocation10 + $0x38] sm:$0xff]  }
  0x78   :  { %763 = vmatprep.subr.bf16.mxu0 %v1015_v0  ;;  %v676_v61 = vld [vmem:[%s1234_s8] ss:$0 sm:$0xff] }
  0x79   :  { %v685_v6 = vld [vmem:[%s1236_s10] ss:$0 sm:$0xff] }
  0x7a   :  { %748 = vmatpush3.bf16.msra.mxu1 %v836_v8 }
  0x7b   :  { %749 = vmatprep.subr.bf16.mxu1 %v1015_v0  ;;  %764 = vmatpush3.bf16.msra.mxu0 %v842_v14 }
  0x7c   :  { %765 = vmatprep.subr.bf16.mxu0 %v1015_v0 }
  0x7e   :  { %750 = vmatpush3.bf16.msra.mxu1 %v837_v9 }
  0x7f   :  { %751 = vmatprep.subr.bf16.mxu1 %v1015_v0  ;;  %766 = vmatpush3.bf16.msra.mxu0 %v843_v15 }
  0x80   :  { %767 = vmatprep.subr.bf16.mxu0 %v1015_v0 }
  0x82   :  { %752 = vmatpush3.bf16.msra.mxu1 %v838_v10 }
  0x83   :  { %753 = vmatprep.subr.bf16.mxu1 %v1015_v0  ;;  %768 = vmatpush3.bf16.msra.mxu0 %v844_v16 }
  0x84   :  { %769 = vmatprep.subr.bf16.mxu0 %v1015_v0 }
  0x86   :  { %754 = vmatpush3.bf16.msra.mxu1 %v839_v11 }
  0x87   :  { %755 = vmatprep.subr.bf16.mxu1 %v1015_v0  ;;  %770 = vmatpush3.bf16.msra.mxu0 %v845_v17 }
  0x88   :  { %771 = vmatprep.subr.bf16.mxu0 %v1015_v0 }
  0x8a   :  { %756 = vmatpush3.bf16.msra.mxu1 %v840_v12 }
  0x8b   :  { %781 = vmatprep.subr.bf16.mxu1 %v1015_v0  ;;  %772 = vmatpush3.bf16.msra.mxu0 %v846_v18 }
  0x8c   :  { %773 = vmatprep.subr.bf16.mxu0 %v1015_v0 }
  0x8f   :  { %774 = vmatpush3.bf16.msra.mxu0 %v847_v27 }
  0x90   :  { %775 = vmatprep.subr.bf16.mxu0 %v1015_v0 }
  0x93   :  { %776 = vmatpush3.bf16.msra.mxu0 %v848_v28 }
  0x94   :  { %801 = vmatprep.subr.bf16.mxu0 %v1015_v0 }
 0x148   :  { %v182_v20 = vpop.f32.mrb[0].mxu0 }
 0x149   :  { %v183_v21 = vadd.f32 %v654_v19, %v182_v20  ;;  %v739_v22 = vpop.f32.mrb[1].mxu0 }
 0x14a   :  { %v185_v23 = vpop.f32.mrb[2].mxu0 }
 0x14b   :  { %v188_v24 = vmax.f32 %v183_v21, 0.0  ;;  %v740_v25 = vpop.f32.mrb[3].mxu0 }
 0x14d   :  { %v189_v26 = vpack.c.bf16 %v188_v24, %v188_v24 }
 0x14f   :  { %758 = vmatmul.mubr.bf16.vlgmr.msra.gmra.mrb[0].mxu1 %v189_v26 }
 0x150   :  { %797 = vmatprep.mubr.msk.bf16.mxu1 %vm1016_vm0, %v1015_v0  ;;  %782 = vmatpush3.bf16.msra.mxu1 %v849_v29 }
 0x151   :  { %783 = vmatprep.subr.bf16.mxu1 %v1015_v0 }
 0x154   :  { %784 = vmatpush3.bf16.msra.mxu1 %v850_v30 }
 0x155   :  { %785 = vmatprep.subr.bf16.mxu1 %v1015_v0 }
 0x158   :  { %786 = vmatpush3.bf16.msra.mxu1 %v851_v31 }
 0x159   :  { %787 = vmatprep.subr.bf16.mxu1 %v1015_v0 }
 0x15c   :  { %788 = vmatpush3.bf16.msra.mxu1 %v852_v32 }
 0x15d   :  { %789 = vmatprep.subr.bf16.mxu1 %v1015_v0 }
 0x160   :  { %790 = vmatpush3.bf16.msra.mxu1 %v853_v33 }
 0x161   :  { %791 = vmatprep.subr.bf16.mxu1 %v1015_v0 }
 0x164   :  { %792 = vmatpush3.bf16.msra.mxu1 %v854_v34 }
 0x165   :  { %793 = vmatprep.subr.bf16.mxu1 %v1015_v0 }
 0x168   :  { %794 = vmatpush3.bf16.msra.mxu1 %v855_v43 }
 0x169   :  { %795 = vmatprep.subr.bf16.mxu1 %v1015_v0 }
 0x16c   :  { %796 = vmatpush3.bf16.msra.mxu1 %v856_v44 }
 0x222   :  { %v295_v36 = vpop.f32.mrb[0].mxu1 }
 0x223   :  { %v296_v37 = vadd.f32 %v658_v35, %v295_v36  ;;  %v759_v38 = vpop.f32.mrb[1].mxu1 }
 0x224   :  { %v298_v39 = vpop.f32.mrb[2].mxu1 }
 0x225   :  { %v301_v40 = vmax.f32 %v296_v37, 0.0  ;;  %v760_v41 = vpop.f32.mrb[3].mxu1 }
 0x227   :  { %v302_v42 = vpack.c.bf16 %v301_v40, %v301_v40 }
 0x229   :  { %778 = vmatmul.mubr.bf16.vlgmr.msra.gmra.mrb[4].mxu0 %v302_v42 }
 0x22a   :  { %817 = vmatprep.mubr.msk.bf16.mxu0 %vm1016_vm0, %v1015_v0  ;;  %802 = vmatpush3.bf16.msra.mxu0 %v857_v45 }
 0x22b   :  { %803 = vmatprep.subr.bf16.mxu0 %v1015_v0 }
 0x22e   :  { %804 = vmatpush3.bf16.msra.mxu0 %v858_v46 }
 0x22f   :  { %805 = vmatprep.subr.bf16.mxu0 %v1015_v0 }
 0x232   :  { %806 = vmatpush3.bf16.msra.mxu0 %v859_v47 }
 0x233   :  { %807 = vmatprep.subr.bf16.mxu0 %v1015_v0 }
 0x236   :  { %808 = vmatpush3.bf16.msra.mxu0 %v860_v48 }
 0x237   :  { %809 = vmatprep.subr.bf16.mxu0 %v1015_v0 }
 0x23a   :  { %810 = vmatpush3.bf16.msra.mxu0 %v861_v49 }
 0x23b   :  { %811 = vmatprep.subr.bf16.mxu0 %v1015_v0 }
 0x23e   :  { %812 = vmatpush3.bf16.msra.mxu0 %v862_v50 }
 0x23f   :  { %813 = vmatprep.subr.bf16.mxu0 %v1015_v0 }
 0x242   :  { %814 = vmatpush3.bf16.msra.mxu0 %v863_v59 }
 0x243   :  { %815 = vmatprep.subr.bf16.mxu0 %v1015_v0 }
 0x246   :  { %816 = vmatpush3.bf16.msra.mxu0 %v864_v60 }
 0x2fc   :  { %v408_v52 = vpop.f32.mrb[4].mxu0 }
 0x2fd   :  { %v409_v53 = vadd.f32 %v667_v51, %v408_v52  ;;  %v779_v54 = vpop.f32.mrb[5].mxu0 }
 0x2fe   :  { %v411_v55 = vpop.f32.mrb[6].mxu0 }
 0x2ff   :  { %v414_v56 = vmax.f32 %v409_v53, 0.0  ;;  %v780_v57 = vpop.f32.mrb[7].mxu0 }
 0x301   :  { %v415_v58 = vpack.c.bf16 %v414_v56, %v414_v56 }
 0x303   :  { %798 = vmatmul.mubr.bf16.vlgmr.msra.gmra.mrb[4].mxu1 %v415_v58 }
 0x3d6   :  { %v521_v62 = vpop.f32.mrb[4].mxu1 }
 0x3d7   :  { %v522_v63 = vadd.f32 %v676_v61, %v521_v62  ;;  %v799_v1 = vpop.f32.mrb[5].mxu1 }
 0x3d8   :  { %v524_v2 = vpop.f32.mrb[6].mxu1 }
 0x3d9   :  { %v527_v3 = vmax.f32 %v522_v63, 0.0  ;;  %v800_v4 = vpop.f32.mrb[7].mxu1 }
 0x3db   :  { %v528_v5 = vpack.c.bf16 %v527_v3, %v527_v3 }
 0x3dd   :  { %818 = vmatmul.mubr.bf16.vlgmr.msra.gmra.mrb[8].mxu0 %v528_v5 }
 0x4b0   :  { %v634_v7 = vpop.f32.mrb[8].mxu0 }
 0x4b1   :  { %v635_v0 = vadd.f32 %v685_v6, %v634_v7  ;;  %v819_v8 = vpop.f32.mrb[9].mxu0 }
 0x4b2   :  { %v637_v9 = vpop.f32.mrb[10].mxu0 }
 0x4b3   :  { %v640_v10 = vmul.f32 0.5, %v635_v0  ;;  %v820_v11 = vpop.f32.mrb[11].mxu0 }
 0x4b5   :  { %865 = vtanh.f32 %v640_v10 }
 0x4bf   :  { %v866_v12 = vpop.eup %865 }
 0x4c0   :  { %v642_v13 = vadd.f32 1.0, %v866_v12 }
 0x4c2   :  { %v643_v14 = vmul.f32 0.5, %v642_v13 }
 0x4c4   :  { %645 = vst.msk [vmem:[%s1237_s11] sm:$0xff] %vm644_vm2, %v643_v14 }
 0x4c5   :  { %650 = vsyncpa [#allocation3], 1 }
 0x4c6   :  { %651 = vsyncpa [#allocation5], 1 }
 0x4c7   :  { %652 = vsyncpa [#allocation8], 1 }
 0x4c8   :  { %653 = vsyncpa [#allocation11], 1 }

</bundles_post_ra>
